<compile_context>
chip_gen: v7x
topology: tpu7x:2x2x1
jax: 0.10.0
libtpu: 0.0.40
codegen_flags: <defaults>
</compile_context>

<pallas_src>
import jax
import jax.numpy as jnp
from jax.experimental import pallas as pl
from jax.experimental.pallas import tpu as pltpu


def _attention_kernel(x_ref, w_ref, b_ref, out_ref):
    # x_ref:   (b_tile, S, H) VMEM input block (pipelined over the batch grid)
    # w_ref:   (1, H)         VMEM Linear weight, f32, resident
    # b_ref:   (1, 1)         SMEM Linear bias (scalar, f32)
    # out_ref: (b_tile, S)    VMEM output block (lane-dense in S)
    x = x_ref[...]
    w = w_ref[...][None]                                  # (1, 1, H) f32, broadcasts

    # Linear(H -> 1): reduce over H (lane axis), accumulating in f32.
    scores = jnp.sum(x * w, axis=-1, dtype=jnp.float32) + b_ref[0, 0]   # (b_tile, S)

    # Softmax over the sequence axis (dim=1 of the PyTorch module), in f32.
    m = jnp.max(scores, axis=1, keepdims=True)            # (b_tile, 1)
    e = jnp.exp(scores - m)                                # (b_tile, S)
    denom = jnp.sum(e, axis=1, keepdims=True)              # (b_tile, 1)
    probs = e / denom                                      # exact normalization
    out_ref[...] = probs.astype(out_ref.dtype)


def _sublane_alignment(dtype) -> int:
    # Sublane packing of the output block's second-to-last dim.
    itemsize = jnp.dtype(dtype).itemsize
    if itemsize >= 4:
        return 8
    if itemsize == 2:
        return 16
    return 32


def attention_forward(lstm_output, weight, bias, *, target_block_bytes=8 * 1024 * 1024):
    """lstm_output: (B, S, H); weight: (1, H); bias: (1,). Returns (B, S) softmax probs."""
    B, S, H = lstm_output.shape
    dtype = lstm_output.dtype
    in_itemsize = jnp.dtype(dtype).itemsize
    out_itemsize = in_itemsize
    align = _sublane_alignment(dtype)

    # Resident f32 weight (tiny; constant index_map => not re-DMA'd per step).
    w = weight.reshape(1, H).astype(jnp.float32)
    bias_2d = bias.reshape(1, 1).astype(jnp.float32)

    # ---- choose the batch tile --------------------------------------------
    bytes_per_batch_row = S * H * in_itemsize
    b_tile = min(B, max(1, target_block_bytes // bytes_per_batch_row))

    # v7x has 2 TensorCores; with "parallel" the batch grid is sharded across
    # them, so keep at least 2 grid blocks whenever alignment allows it.
    if B >= 2 * align:
        cap = max(align, (pl.cdiv(B, 2) // align) * align)
        b_tile = min(b_tile, cap)

    if b_tile < B:
        # Sublane-align the output block's leading dim (full-B blocks are
        # always legal regardless of alignment).
        b_tile = max(align, (b_tile // align) * align)

    # ---- VMEM budget: derive the limit from the working set ----------------
    def working_set(bt):
        return (2 * bt * S * H * in_itemsize          # double-buffered input block
                + 2 * bt * S * out_itemsize           # double-buffered output block
                + H * 4 + 4                            # weight + bias
                + (1 << 20))                           # slack for compiler scratch

    try:
        vmem_cap = int(pltpu.get_tpu_info().vmem_capacity_bytes)
    except Exception:
        vmem_cap = 64 * 1024 * 1024                    # conservative (v7x per-TC)
    budget = (vmem_cap * 3) // 4                       # leave headroom

    # Shrink the tile if the double-buffered working set would not fit.
    while working_set(b_tile) > budget and b_tile > align:
        if b_tile == B:
            b_tile = max(align, ((B - 1) // align) * align)
        else:
            b_tile = max(align, b_tile - align)
    # TODO(synk): if even a (align, S, H) block exceeds the VMEM budget (very
    # large S*H), add an "arbitrary" S-grid axis with online (flash-style)
    # softmax in VMEM scratch instead of shrinking the batch tile.

    vmem_limit = int(min(max(working_set(b_tile), 16 * 1024 * 1024), vmem_cap))

    # ---- pad the batch so the grid covers it exactly -----------------------
    n_blocks = pl.cdiv(B, b_tile)
    b_pad = n_blocks * b_tile
    x = lstm_output
    if b_pad != B:
        x = jnp.pad(x, ((0, b_pad - B), (0, 0), (0, 0)))

    out = pl.pallas_call(
        _attention_kernel,
        out_shape=jax.ShapeDtypeStruct((b_pad, S), dtype),
        grid=(n_blocks,),
        in_specs=[
            pl.BlockSpec((b_tile, S, H), lambda i: (i, 0, 0)),            # x (pipelined)
            pl.BlockSpec((1, H), lambda i: (0, 0)),                        # weight (resident, f32)
            pl.BlockSpec((1, 1), lambda i: (0, 0),
                         memory_space=pltpu.MemorySpace.SMEM),             # bias scalar
        ],
        out_specs=pl.BlockSpec((b_tile, S), lambda i: (i, 0)),
        compiler_params=pltpu.CompilerParams(
            dimension_semantics=("parallel",),    # v7x: shard batch blocks across both TCs
            vmem_limit_bytes=vmem_limit,
        ),
    )(x, w, bias_2d)

    return out[:B] if b_pad != B else out


if __name__ == "__main__":
    key = jax.random.PRNGKey(0)
    k_x, k_w, k_b, k_x2 = jax.random.split(key, 4)

    B, S, H = 2, 8, 32

    # Deterministic parameter init (mimics nn.Linear's uniform(-1/sqrt(H), 1/sqrt(H))).
    bound = 1.0 / (H ** 0.5)
    weight = jax.random.uniform(k_w, (1, H), jnp.float32, minval=-bound, maxval=bound)
    bias = jax.random.uniform(k_b, (1,), jnp.float32, minval=-bound, maxval=bound)
    lstm_output = jax.random.normal(k_x, (B, S, H), dtype=jnp.float32)

    out = jax.block_until_ready(attention_forward(lstm_output, weight, bias))

    # Reference check in plain JAX.
    ref = jax.nn.softmax(lstm_output @ weight[0] + bias[0], axis=1)
    assert out.shape == (B, S)
    assert jnp.allclose(out, ref, atol=1e-3, rtol=1e-3), "mismatch vs reference"
    assert jnp.allclose(jnp.sum(out, axis=1), 1.0, atol=1e-3), "rows must sum to 1"

    # Also exercise the multi-block / padded-batch pipelined path (grid > 1).
    B2 = 20
    x2 = jax.random.normal(k_x2, (B2, S, H), dtype=jnp.float32)
    out2 = jax.block_until_ready(
        attention_forward(x2, weight, bias, target_block_bytes=1024))
    ref2 = jax.nn.softmax(x2 @ weight[0] + bias[0], axis=1)
    assert out2.shape == (B2, S)
    assert jnp.allclose(out2, ref2, atol=1e-3, rtol=1e-3), "tiled path mismatch"
    assert jnp.allclose(jnp.sum(out2, axis=1), 1.0, atol=1e-3), "tiled rows must sum to 1"

    print("KERNEL_OK")
</pallas_src>

<mosaic_0001>
module attributes {stable_mosaic.version = 11 : i64} {
  func.func @_attention_kernel(%arg0: i32, %arg1: memref<2x8x32xf32, #tpu.memory_space<vmem>>, %arg2: memref<1x32xf32, #tpu.memory_space<vmem>>, %arg3: memref<1x1xf32, #tpu.memory_space<smem>>, %arg4: memref<2x8xf32, #tpu.memory_space<vmem>>) attributes {dimension_semantics = [#tpu.dimension_semantics<parallel>], iteration_bounds = array<i64: 1>, scalar_prefetch = 0 : i64, scratch_operands = 0 : i64, tpu.core_type = #tpu.core_type<tc>, window_params = [{transform_indices = @transform_0, window_bounds = array<i64: 2, 8, 32>}, {pipeline_mode = #tpu.pipeline_mode<synchronous>, transform_indices = @transform_1, window_bounds = array<i64: 1, 32>}, {transform_indices = @transform_2, window_bounds = array<i64: 1, 1>}, {transform_indices = @transform_3, window_bounds = array<i64: 2, 8>}]} {
    %c0 = arith.constant 0 : index
    %c0_0 = arith.constant 0 : index
    %c0_1 = arith.constant 0 : index
    %0 = vector.load %arg1[%c0, %c0_0, %c0_1] : memref<2x8x32xf32, #tpu.memory_space<vmem>>, vector<2x8x32xf32>
    %c0_2 = arith.constant 0 : index
    %c0_3 = arith.constant 0 : index
    %1 = vector.load %arg2[%c0_2, %c0_3] : memref<1x32xf32, #tpu.memory_space<vmem>>, vector<1x32xf32>
    %2 = vector.shape_cast %1 : vector<1x32xf32> to vector<1x1x32xf32>
    %3 = vector.broadcast %2 : vector<1x1x32xf32> to vector<2x8x32xf32>
    %4 = arith.mulf %0, %3 : vector<2x8x32xf32>
    %cst = arith.constant dense<0.000000e+00> : vector<2x8xf32>
    %5 = vector.multi_reduction <add>, %4, %cst [2] : vector<2x8x32xf32> to vector<2x8xf32>
    %c0_4 = arith.constant 0 : index
    %c0_5 = arith.constant 0 : index
    %6 = memref.load %arg3[%c0_4, %c0_5] : memref<1x1xf32, #tpu.memory_space<smem>>
    %7 = vector.broadcast %6 : f32 to vector<2x8xf32>
    %8 = arith.addf %5, %7 : vector<2x8xf32>
    %cst_6 = arith.constant dense<0xFF800000> : vector<2xf32>
    %9 = vector.multi_reduction <maximumf>, %8, %cst_6 [1] : vector<2x8xf32> to vector<2xf32>
    %10 = vector.shape_cast %9 : vector<2xf32> to vector<2x1xf32>
    %11 = vector.broadcast %10 : vector<2x1xf32> to vector<2x8xf32>
    %12 = arith.subf %8, %11 : vector<2x8xf32>
    %13 = math.exp %12 : vector<2x8xf32>
    %cst_7 = arith.constant dense<0.000000e+00> : vector<2xf32>
    %14 = vector.multi_reduction <add>, %13, %cst_7 [1] : vector<2x8xf32> to vector<2xf32>
    %15 = vector.shape_cast %14 : vector<2xf32> to vector<2x1xf32>
    %16 = vector.broadcast %15 : vector<2x1xf32> to vector<2x8xf32>
    %17 = arith.divf %13, %16 : vector<2x8xf32>
    %c0_8 = arith.constant 0 : index
    %c0_9 = arith.constant 0 : index
    %18 = vector.load %arg4[%c0_8, %c0_9] : memref<2x8xf32, #tpu.memory_space<vmem>>, vector<2x8xf32>
    tpu.vector_store %arg4[%c0_8, %c0_9], %17 {strides = array<i32>} : memref<2x8xf32, #tpu.memory_space<vmem>>, vector<2x8xf32>,
    return
  }
  func.func @transform_0(%arg0: i32) -> (i32, i32, i32) {
    %c0_i32 = arith.constant 0 : i32
    %c0_i32_0 = arith.constant 0 : i32
    %c0_i32_1 = arith.constant 0 : i32
    return %arg0, %c0_i32, %c0_i32_0 : i32, i32, i32
  }
  func.func @transform_1(%arg0: i32) -> (i32, i32) {
    %c0_i32 = arith.constant 0 : i32
    %c0_i32_0 = arith.constant 0 : i32
    %c0_i32_1 = arith.constant 0 : i32
    return %c0_i32, %c0_i32_0 : i32, i32
  }
  func.func @transform_2(%arg0: i32) -> (i32, i32) {
    %c0_i32 = arith.constant 0 : i32
    %c0_i32_0 = arith.constant 0 : i32
    %c0_i32_1 = arith.constant 0 : i32
    return %c0_i32, %c0_i32_0 : i32, i32
  }
  func.func @transform_3(%arg0: i32) -> (i32, i32) {
    %c0_i32 = arith.constant 0 : i32
    %c0_i32_0 = arith.constant 0 : i32
    return %arg0, %c0_i32 : i32, i32
  }
}

</mosaic_0001>

<bundles_post_ra>
// kernel: tpu_custom_call.1
= control target key start
LH: loop header
LB: loop body
LE: loop exit
PB: predicated region body
PF: predicated region fallthrough
CT: control target
= control target key end

     0   :  { %9 = vsyncpa [#allocation4], 0  ;;  %s283_s0 = inlined_call_operand.hbm [shape: f32[2,8,32], index: 0, kind: input, shape index: {}]   ;;  %s284_s1 = inlined_call_operand.vmem [shape: f32[1,32], index: 1, kind: input, shape index: {}]   ;;  %s285_s2 = inlined_call_operand.<no memory space> [shape: f32[1,1], index: 2, kind: input, shape index: {}]   ;;  %s286_s3 = inlined_call_operand.hbm [shape: f32[2,8], index: 3, kind: output, shape index: {}]  }
   0x1   :  { %10 = vsyncpa [#allocation5], 0  ;;  %s222_s12 = smov [#allocation3]   ;;  %s174_s16 = scalar_lea.hbm %s283_s0, 256 }
   0x2   :  { %s16_s13 = sshll.u32 %s222_s12, 4  ;;  %p175_p0 = scmp.ne.s32.totalorder %s283_s0, %s174_s16  ;;  %s17_s13 = int_to_ptr.vmem [resolvable:$true] %s16_s13 }
   0x3   :  { %p178_p1 = scmp.lt.u32.totalorder %s174_s16, %s283_s0 }
   0x5   :  { %p180_p2 = pnand %p178_p1, %p175_p0 }
   0x7   :  { %183 = shalt.err (!%p180_p2)
}
   0x8   :  { %s184_s21 = scalar_lea.vmem %s17_s13, 256  ;;  %p189_p4 = scmp.lt.s32.totalorder %s17_s13, %s17_s13 }
   0x9   :  { %p185_p3 = scmp.ne.s32.totalorder %s17_s13, %s184_s21  ;;  %p190_p5 = scmp.lt.s32.totalorder %s184_s21, %s184_s21 }
   0xb   :  { %p191_p6 = por %p190_p5, %p189_p4 }
   0xd   :  { %p192_p7 = pnand %p191_p6, %p185_p3 }
   0xf   :  { %195 = shalt.err (!%p192_p7)
}
  0x10   :  { %s223_s22 = smov 128   ;;  %s224_s23 = smov 8  }
  0x11   :  { %22 = dma.hbm_to_vmem [thread:$0]  %s283_s0, 256, %s17_s13, [#allocation4], %s223_s22, %s223_s22, %s224_s23  }
  0x12   :  { %218 = dma.done.wait [#allocation4], 256  }
  0x13   :  { %219 = vsyncadd [#allocation4], 4294967040  ;;  %v30_v0 = vld [vmem:[#allocation3] sm:$0xff]  ;;  %vm41_vm0 = vcmask 261120   ;;  %v31_v2 = vld [vmem:[#allocation3 + $0x8] sm:$0xff]  ;;  %v54_v7 = vlaneseq  ;;  %v49_v10 = vstv %s285_s2  ;;  %vm64_vm1 = vcmask 1041409  }
  0x14   :  { %v158_v1 = vld [vmem:[%s284_s1] ss:$0 sm:$0xff]  ;;  %vm67_vm2 = vcmask 58368   ;;  %v225_v20 = vmov 0   ;;  %s226_s1 = smov [#allocation6]  }
  0x15   :  { %v39_v3 = vmul.f32 %v158_v1, %v30_v0  ;;  %v40_v4 = vmul.f32 %v158_v1, %v31_v2  ;;  %v55_v8 = vand.u32 127, %v54_v7  ;;  %v57_v9 = vshrl.u32 %v54_v7, 7  ;;  %165 = vset.pattern.permute.xlu0 %v225_v20  ;;  %164 = vset.pattern.permute.xlu1 %v225_v20  ;;  %s149_s2 = sshll.u32 %s226_s1, 4  ;;  %s150_s2 = int_to_ptr.vmem [resolvable:$true] %s149_s2 }
  0x16   :  { %s196_s29 = scalar_lea.vmem %s150_s2, 32  ;;  %p201_p9 = scmp.lt.s32.totalorder %s150_s2, %s150_s2 }
  0x17   :  { %v42_v5 = vsel %vm41_vm0, %v39_v3, 0.0  ;;  %v45_v6 = vsel %vm41_vm0, %v40_v4, 0.0  ;;  %v58_v12 = vsub.s32 %v55_v8, %v57_v9  ;;  %v74_v21 = vsub.s32 0, %v57_v9  ;;  %p197_p8 = scmp.ne.s32.totalorder %s150_s2, %s196_s29  ;;  %p202_p10 = scmp.lt.s32.totalorder %s196_s29, %s196_s29 }
  0x18   :  { %43 = vadd.xlane.f32.xlu0 %v42_v5  ;;  %v78_v22 = vsub.s32 1, %v57_v9 }
  0x19   :  { %p203_p11 = por %p202_p10, %p201_p9 }
  0x1b   :  { %p204_p12 = pnand %p203_p11, %p197_p8 }
  0x1c   :  { %46 = vadd.xlane.f32.xlu0 %v45_v6 }
  0xa5   :  { %v44_v11 = vpop.xlane.xlu0 %43 }
  0xa6   :  { %v50_v13 = vadd.f32 %v49_v10, %v44_v11 }
  0xa8   :  { %v59_v16 = vrot.slane %v50_v13, %v58_v12 }
  0xa9   :  { %v47_v14 = vpop.xlane.xlu0 %46 }
  0xaa   :  { %v51_v15 = vadd.f32 %v49_v10, %v47_v14 }
  0xac   :  { %v63_v17 = vrot.slane %v51_v15, %v58_v12 }
  0xae   :  { %v65_v18 = vsel %vm64_vm1, %v63_v17, %v59_v16 }
  0xaf   :  { %v68_v19 = vsel %vm67_vm2, %v65_v18, -inf }
  0xb0   :  { %69 = vmax.xlane.f32.xlu1 %v68_v19 }
 0x13d   :  { %v70_v23 = vpop.xlane.xlu1 %69 }
 0x13e   :  { %v75_v24 = vrot.slane %v70_v23, %v74_v21  ;;  %v79_v25 = vrot.slane %v70_v23, %v78_v22 }
 0x140   :  { %v82_v26 = vsub.f32 %v50_v13, %v75_v24  ;;  %v83_v27 = vsub.f32 %v51_v15, %v79_v25 }
 0x142   :  { %v84_v28 = vmul.f32 1.442695, %v82_v26  ;;  %v86_v29 = vmul.f32 1.442695, %v83_v27 }
 0x144   :  { %166 = vpow2.f32 %v84_v28 }
 0x145   :  { %168 = vpow2.f32 %v86_v29 }
 0x14e   :  { %v167_v30 = vpop.eup %166 }
 0x14f   :  { %v169_v31 = vpop.eup %168  ;;  %91 = vperm.xlu1 %164, %v167_v30  }
 0x150   :  { %94 = vperm.xlu0 %165, %v169_v31  }
 0x1ce   :  { %v92_v32 = vpop.permute.xlu1 %91 }
 0x1cf   :  { %v95_v33 = vpop.permute.xlu0 %94  ;;  %v99_v34 = vrot.slane %v92_v32, %v58_v12 }
 0x1d0   :  { %v103_v35 = vrot.slane %v95_v33, %v58_v12 }
 0x1d2   :  { %v104_v36 = vsel %vm64_vm1, %v103_v35, %v99_v34 }
 0x1d3   :  { %v106_v37 = vsel %vm67_vm2, %v104_v36, 0.0 }
 0x1d4   :  { %107 = vadd.xlane.f32.xlu1 %v106_v37 }
 0x261   :  { %v108_v38 = vpop.xlane.xlu1 %107 }
 0x262   :  { %v113_v39 = vrot.slane %v108_v38, %v74_v21  ;;  %v117_v40 = vrot.slane %v108_v38, %v78_v22 }
 0x264   :  { %170 = vrcp.f32 %v113_v39 }
 0x265   :  { %172 = vrcp.f32 %v117_v40 }
 0x26e   :  { %v171_v41 = vpop.eup %170 }
 0x26f   :  { %v121_v42 = vmul.f32 %v171_v41, %v167_v30  ;;  %v173_v43 = vpop.eup %172 }
 0x270   :  { %v123_v44 = vmul.f32 %v173_v43, %v169_v31 }
 0x271   :  { %127 = vperm.xlu0 %165, %v121_v42  }
 0x275   :  { %130 = vperm.xlu0 %165, %v123_v44  }
 0x2f0   :  { %v128_v45 = vpop.permute.xlu0 %127 }
 0x2f1   :  { %v135_v47 = vrot.slane %v128_v45, %v58_v12 }
 0x2f4   :  { %v131_v46 = vpop.permute.xlu0 %130 }
 0x2f5   :  { %v139_v48 = vrot.slane %v131_v46, %v58_v12 }
 0x2f7   :  { %v140_v49 = vsel %vm64_vm1, %v139_v48, %v135_v47 }
 0x2f8   :  { %142 = vst.msk [vmem:[#allocation6] sm:$0x3] %vm67_vm2, %v140_v49 }
 0x2f9   :  { %207 = shalt.err (!%p204_p12)
}
 0x2fa   :  { %s208_s5 = scalar_lea.hbm %s286_s3, 32 }
 0x2fb   :  { %p209_p13 = scmp.ne.s32.totalorder %s286_s3, %s208_s5  ;;  %p212_p0 = scmp.lt.u32.totalorder %s208_s5, %s286_s3 }
 0x2fd   :  { %p214_p1 = pnand %p212_p0, %p209_p13 }
 0x2ff   :  { %217 = shalt.err (!%p214_p1)
}
 0x300   :  { %152 = dma.vmem_to_hbm [thread:$0]  %s150_s2, 32, %s286_s3, [#allocation5]  }
 0x301   :  { %220 = dma.done.wait [#allocation5], 32  }
 0x302   :  { %221 = vsyncadd [#allocation5], 4294967264 }
 0x303   :  { %156 = vsyncpa [#allocation4], 1 }
 0x304   :  { %157 = vsyncpa [#allocation5], 1 }

</bundles_post_ra>
